<compile_context>
chip_gen: v5e
topology: v5e:2x2
jax: 0.10.0
libtpu: 0.0.40
codegen_flags: <defaults>
</compile_context>

<pallas_src>
import functools
import itertools

import jax
import jax.numpy as jnp
from jax.experimental import pallas as pl
from jax.experimental.pallas import tpu as pltpu


def _round_up(v, m):
    return ((v + m - 1) // m) * m


# ----------------------------------------------------------------------------
# Pallas kernel: one output row (Wo, Coutp) per grid step.
#   refs = (x_off_0, ..., x_off_{n_outer-1}, w_ref, shift_ref, o_ref)
#   x_off_o  : (stride, Wq, Cin)    bf16  padded input row for outer kernel
#                                         offset o, W phase-deinterleaved
#   w_ref    : (k**ndim, Cin, Coutp) bf16 BN-scale-folded weights
#   shift_ref: (1, Coutp)            f32  folded conv-bias + BN shift
#   o_ref    : (Wo, Coutp)           f32  (Coutp = Cout padded to 128)
# ----------------------------------------------------------------------------
def _conv_row_kernel(*refs, n_outer, k, wo, stride, activation):
    row_refs = refs[:n_outer]
    w_ref, shift_ref, o_ref = refs[n_outer:n_outer + 3]
    coutp = o_ref.shape[-1]

    acc = jnp.zeros((wo, coutp), jnp.float32)
    for o in range(n_outer):              # outer kernel offsets (dy) / (dz,dy)
        row = row_refs[o]
        for dx in range(k):               # innermost (W) kernel offset
            # Contiguous (Wo, Cin) slab: phase dx%stride, start dx//stride.
            piece = row[dx % stride, pl.ds(dx // stride, wo), :]
            acc = acc + jnp.dot(piece, w_ref[o * k + dx],
                                preferred_element_type=jnp.float32)

    y = acc + shift_ref[...]              # f32 epilogue (keeps v5e VPU happy)
    if activation:
        y = jnp.maximum(y, 0.0)
    o_ref[...] = y.astype(o_ref.dtype)


# ----------------------------------------------------------------------------
# ConvMD forward (conv -> BN(eval) -> ReLU)
# ----------------------------------------------------------------------------
def conv_md_forward(x, params, *, input_dim, kernel_size, stride, padding,
                    bn=True, activation=True, eps=1e-5):
    assert input_dim in (2, 3), "Choose between 2D and 3D input."
    assert x.ndim == 2 + input_dim
    k, s, p = kernel_size, stride, padding

    N, cin = x.shape[0], x.shape[1]
    spatial = x.shape[2:]
    out_sp = tuple((d + 2 * p - k) // s + 1 for d in spatial)
    outer_out = out_sp[:-1]                   # (Ho,) for 2D, (Do, Ho) for 3D
    wo = out_sp[-1]
    n_outer = k ** (input_dim - 1)

    weight = params["weight"].astype(jnp.float32)   # (cout, cin, *([k]*nd))
    bias = params["bias"].astype(jnp.float32)
    cout = weight.shape[0]
    coutp = _round_up(cout, 128)              # lane-dense output channels
    # (For large MXU-bound layers on v6e/v7x, prefer multiples of 256.)

    # --- BN(eval) folding: y = conv @ (w*scale) + (beta + scale*(bias-mean))
    if bn:
        gamma = params["gamma"].astype(jnp.float32)
        beta = params["beta"].astype(jnp.float32)
        mean = params["running_mean"].astype(jnp.float32)
        var = params["running_var"].astype(jnp.float32)
        scale = gamma / jnp.sqrt(var + eps)
        shift = beta + scale * (bias - mean)
    else:
        scale = jnp.ones((cout,), jnp.float32)
        shift = bias

    # Folded weight laid out (k**ndim, cin, coutp): one aligned (cin, coutp)
    # slab per kernel offset, offset index = ((dz*k)+dy)*k + dx (row-major).
    w_mat = jnp.transpose(weight, tuple(range(2, 2 + input_dim)) + (1, 0))
    w_mat = w_mat.reshape(k ** input_dim, cin, cout) * scale[None, None, :]
    w_mat = jnp.pad(w_mat, ((0, 0), (0, 0), (0, coutp - cout)))
    w_mat = w_mat.astype(jnp.bfloat16)
    shift_p = jnp.pad(shift, (0, coutp - cout)).reshape(1, coutp)

    # --- Input prep: channels-last, spatially zero-padded, W phase-split so
    #     every in-kernel W access is contiguous regardless of stride.
    xp = jnp.transpose(x, (0,) + tuple(range(2, 2 + input_dim)) + (1,))
    wp = spatial[-1] + 2 * p
    wq = _round_up(wp, s) // s                 # W columns per phase
    pad_cfg = (((0, 0),) + ((p, p),) * (input_dim - 1)
               + ((p, p + (wq * s - wp)),) + ((0, 0),))
    xp = jnp.pad(xp, pad_cfg)                  # extra W pad is never read
    xp = xp.reshape(xp.shape[:-2] + (wq, s, cin))
    perm = tuple(range(xp.ndim - 3)) + (xp.ndim - 2, xp.ndim - 3, xp.ndim - 1)
    xp = jnp.transpose(xp, perm).astype(jnp.bfloat16)
    # xp: (N, [Dp,] Hp, s, Wq, cin)  bf16

    grid = (N,) + outer_out
    garity = len(grid)

    def _in_spec(outer_off):
        block = (None,) * garity + (s, wq, cin)

        def idx(*g, _off=outer_off):
            n = g[0]
            outer = tuple(g[1 + a] * s + _off[a] for a in range(len(_off)))
            return (n,) + outer + (0, 0, 0)

        return pl.BlockSpec(block, idx)

    outer_offsets = list(itertools.product(range(k), repeat=input_dim - 1))
    in_specs = [_in_spec(off) for off in outer_offsets]
    in_specs += [
        pl.BlockSpec((k ** input_dim, cin, coutp), lambda *g: (0, 0, 0)),
        pl.BlockSpec((1, coutp), lambda *g: (0, 0)),
    ]
    out_spec = pl.BlockSpec((None,) * garity + (wo, coutp),
                            lambda *g: tuple(g) + (0, 0))

    kernel = functools.partial(
        _conv_row_kernel, n_outer=n_outer, k=k, wo=wo, stride=s,
        activation=activation)

    # Note: if exposed DMA time on the row streams shows up for real layer
    # sizes, bump the input specs to pipeline_mode=pl.Buffered(3).
    out = pl.pallas_call(
        kernel,
        out_shape=jax.ShapeDtypeStruct((N,) + out_sp + (coutp,), jnp.float32),
        grid=grid,
        in_specs=in_specs,
        out_specs=out_spec,
        compiler_params=pltpu.CompilerParams(
            dimension_semantics=("parallel",) * garity,
            vmem_limit_bytes=32 * 1024 * 1024),
    )(*([xp] * n_outer), w_mat, shift_p)

    out = out[..., :cout]                      # drop padded output channels
    perm = (0, 1 + input_dim) + tuple(range(1, 1 + input_dim))
    return jnp.transpose(out, perm)            # back to NC{D}HW


# ----------------------------------------------------------------------------
# Reference (pure JAX) for verification
# ----------------------------------------------------------------------------
def _reference(x, params, *, input_dim, stride, padding, bn, activation,
               eps=1e-5):
    if input_dim == 2:
        dn = ("NCHW", "OIHW", "NCHW")
    else:
        dn = ("NCDHW", "OIDHW", "NCDHW")
    y = jax.lax.conv_general_dilated(
        x.astype(jnp.float32), params["weight"].astype(jnp.float32),
        window_strides=(stride,) * input_dim,
        padding=[(padding, padding)] * input_dim,
        dimension_numbers=dn)
    cshape = (1, -1) + (1,) * input_dim
    y = y + params["bias"].reshape(cshape)
    if bn:
        y = (y - params["running_mean"].reshape(cshape)) / jnp.sqrt(
            params["running_var"].reshape(cshape) + eps)
        y = y * params["gamma"].reshape(cshape) + params["beta"].reshape(cshape)
    if activation:
        y = jnp.maximum(y, 0.0)
    return y


def _make_params(key, cin, cout, k, input_dim):
    ks = jax.random.split(key, 6)
    wshape = (cout, cin) + (k,) * input_dim
    fan_in = cin * k ** input_dim
    bound = 1.0 / jnp.sqrt(fan_in)
    return {
        "weight": jax.random.uniform(ks[0], wshape, jnp.float32, -bound, bound),
        "bias": jax.random.uniform(ks[1], (cout,), jnp.float32, -bound, bound),
        "gamma": jax.random.uniform(ks[2], (cout,), jnp.float32, 0.5, 1.5),
        "beta": jax.random.uniform(ks[3], (cout,), jnp.float32, -0.5, 0.5),
        "running_mean": jax.random.uniform(ks[4], (cout,), jnp.float32, -0.5, 0.5),
        "running_var": jax.random.uniform(ks[5], (cout,), jnp.float32, 0.5, 1.5),
    }


if __name__ == "__main__":
    key = jax.random.PRNGKey(0)
    kx2, kp2, kx3, kp3 = jax.random.split(key, 4)

    # ---- 2D case: ConvMD(2, cin=4, cout=8, k=3, stride=1, padding=1) ----
    x2 = jax.random.normal(kx2, (2, 4, 16, 16), jnp.float32)
    p2 = _make_params(kp2, cin=4, cout=8, k=3, input_dim=2)
    y2 = conv_md_forward(x2, p2, input_dim=2, kernel_size=3, stride=1,
                         padding=1, bn=True, activation=True)
    jax.block_until_ready(y2)
    r2 = _reference(x2, p2, input_dim=2, stride=1, padding=1,
                    bn=True, activation=True)
    assert y2.shape == (2, 8, 16, 16), y2.shape
    # bf16 matmul inputs (f32 accumulate) -> loosened tolerance vs f32 reference
    assert jnp.allclose(y2, r2, atol=3e-2, rtol=3e-2), "2D mismatch"

    # ---- 3D case: ConvMD(3, cin=3, cout=8, k=3, stride=2, padding=1) ----
    x3 = jax.random.normal(kx3, (2, 3, 6, 8, 8), jnp.float32)
    p3 = _make_params(kp3, cin=3, cout=8, k=3, input_dim=3)
    y3 = conv_md_forward(x3, p3, input_dim=3, kernel_size=3, stride=2,
                         padding=1, bn=True, activation=True)
    jax.block_until_ready(y3)
    r3 = _reference(x3, p3, input_dim=3, stride=2, padding=1,
                    bn=True, activation=True)
    assert y3.shape == (2, 8, 3, 4, 4), y3.shape
    assert jnp.allclose(y3, r3, atol=3e-2, rtol=3e-2), "3D mismatch"

    print("KERNEL_OK")
</pallas_src>

<mosaic_0001>
module attributes {stable_mosaic.version = 11 : i64} {
  func.func @_conv_row_kernel(%arg0: i32, %arg1: i32, %arg2: memref<1x1x1x18x4xbf16, #tpu.memory_space<vmem>>, %arg3: memref<1x1x1x18x4xbf16, #tpu.memory_space<vmem>>, %arg4: memref<1x1x1x18x4xbf16, #tpu.memory_space<vmem>>, %arg5: memref<9x4x128xbf16, #tpu.memory_space<vmem>>, %arg6: memref<1x128xf32, #tpu.memory_space<vmem>>, %arg7: memref<1x1x16x128xf32, #tpu.memory_space<vmem>>) attributes {dimension_semantics = [#tpu.dimension_semantics<parallel>, #tpu.dimension_semantics<parallel>], iteration_bounds = array<i64: 2, 16>, scalar_prefetch = 0 : i64, scratch_operands = 0 : i64, tpu.core_type = #tpu.core_type<tc>, window_params = [{transform_indices = @transform_0, window_bounds = array<i64: 1, 1, 1, 18, 4>}, {transform_indices = @transform_1, window_bounds = array<i64: 1, 1, 1, 18, 4>}, {transform_indices = @transform_2, window_bounds = array<i64: 1, 1, 1, 18, 4>}, {pipeline_mode = #tpu.pipeline_mode<synchronous>, transform_indices = @transform_3, window_bounds = array<i64: 9, 4, 128>}, {pipeline_mode = #tpu.pipeline_mode<synchronous>, transform_indices = @transform_4, window_bounds = array<i64: 1, 128>}, {transform_indices = @transform_5, window_bounds = array<i64: 1, 1, 16, 128>}]} {
    %cst = arith.constant 0.000000e+00 : f32
    %0 = vector.broadcast %cst : f32 to vector<16x128xf32>
    %c0 = arith.constant 0 : index
    %c0_0 = arith.constant 0 : index
    %c0_1 = arith.constant 0 : index
    %c0_2 = arith.constant 0 : index
    %c0_3 = arith.constant 0 : index
    %1 = vector.load %arg2[%c0, %c0_0, %c0_1, %c0_2, %c0_3] : memref<1x1x1x18x4xbf16, #tpu.memory_space<vmem>>, vector<1x1x1x16x4xbf16>
    %2 = vector.shape_cast %1 : vector<1x1x1x16x4xbf16> to vector<16x4xbf16>
    %c0_4 = arith.constant 0 : index
    %c0_5 = arith.constant 0 : index
    %c0_6 = arith.constant 0 : index
    %3 = vector.load %arg5[%c0_4, %c0_5, %c0_6] : memref<9x4x128xbf16, #tpu.memory_space<vmem>>, vector<1x4x128xbf16>
    %4 = vector.shape_cast %3 : vector<1x4x128xbf16> to vector<4x128xbf16>
    %cst_7 = arith.constant dense<0.000000e+00> : vector<16x128xf32>
    %5 = tpu.matmul %2, %4, %cst_7 {dimension_numbers = #tpu.dot_dimension_numbers<[1], [0], [0], [1], [0, 0, 1, 1], [], []>} : vector<16x4xbf16>, vector<4x128xbf16>, vector<16x128xf32> -> vector<16x128xf32>
    %6 = arith.addf %0, %5 : vector<16x128xf32>
    %c0_8 = arith.constant 0 : index
    %c0_9 = arith.constant 0 : index
    %c0_10 = arith.constant 0 : index
    %c1 = arith.constant 1 : index
    %c0_11 = arith.constant 0 : index
    %7 = vector.load %arg2[%c0_8, %c0_9, %c0_10, %c1, %c0_11] : memref<1x1x1x18x4xbf16, #tpu.memory_space<vmem>>, vector<1x1x1x16x4xbf16>
    %8 = vector.shape_cast %7 : vector<1x1x1x16x4xbf16> to vector<16x4xbf16>
    %c1_12 = arith.constant 1 : index
    %c0_13 = arith.constant 0 : index
    %c0_14 = arith.constant 0 : index
    %9 = vector.load %arg5[%c1_12, %c0_13, %c0_14] : memref<9x4x128xbf16, #tpu.memory_space<vmem>>, vector<1x4x128xbf16>
    %10 = vector.shape_cast %9 : vector<1x4x128xbf16> to vector<4x128xbf16>
    %cst_15 = arith.constant dense<0.000000e+00> : vector<16x128xf32>
    %11 = tpu.matmul %8, %10, %cst_15 {dimension_numbers = #tpu.dot_dimension_numbers<[1], [0], [0], [1], [0, 0, 1, 1], [], []>} : vector<16x4xbf16>, vector<4x128xbf16>, vector<16x128xf32> -> vector<16x128xf32>
    %12 = arith.addf %6, %11 : vector<16x128xf32>
    %c0_16 = arith.constant 0 : index
    %c0_17 = arith.constant 0 : index
    %c0_18 = arith.constant 0 : index
    %c2 = arith.constant 2 : index
    %c0_19 = arith.constant 0 : index
    %13 = vector.load %arg2[%c0_16, %c0_17, %c0_18, %c2, %c0_19] : memref<1x1x1x18x4xbf16, #tpu.memory_space<vmem>>, vector<1x1x1x16x4xbf16>
    %14 = vector.shape_cast %13 : vector<1x1x1x16x4xbf16> to vector<16x4xbf16>
    %c2_20 = arith.constant 2 : index
    %c0_21 = arith.constant 0 : index
    %c0_22 = arith.constant 0 : index
    %15 = vector.load %arg5[%c2_20, %c0_21, %c0_22] : memref<9x4x128xbf16, #tpu.memory_space<vmem>>, vector<1x4x128xbf16>
    %16 = vector.shape_cast %15 : vector<1x4x128xbf16> to vector<4x128xbf16>
    %cst_23 = arith.constant dense<0.000000e+00> : vector<16x128xf32>
    %17 = tpu.matmul %14, %16, %cst_23 {dimension_numbers = #tpu.dot_dimension_numbers<[1], [0], [0], [1], [0, 0, 1, 1], [], []>} : vector<16x4xbf16>, vector<4x128xbf16>, vector<16x128xf32> -> vector<16x128xf32>
    %18 = arith.addf %12, %17 : vector<16x128xf32>
    %c0_24 = arith.constant 0 : index
    %c0_25 = arith.constant 0 : index
    %c0_26 = arith.constant 0 : index
    %c0_27 = arith.constant 0 : index
    %c0_28 = arith.constant 0 : index
    %19 = vector.load %arg3[%c0_24, %c0_25, %c0_26, %c0_27, %c0_28] : memref<1x1x1x18x4xbf16, #tpu.memory_space<vmem>>, vector<1x1x1x16x4xbf16>
    %20 = vector.shape_cast %19 : vector<1x1x1x16x4xbf16> to vector<16x4xbf16>
    %c3 = arith.constant 3 : index
    %c0_29 = arith.constant 0 : index
    %c0_30 = arith.constant 0 : index
    %21 = vector.load %arg5[%c3, %c0_29, %c0_30] : memref<9x4x128xbf16, #tpu.memory_space<vmem>>, vector<1x4x128xbf16>
    %22 = vector.shape_cast %21 : vector<1x4x128xbf16> to vector<4x128xbf16>
    %cst_31 = arith.constant dense<0.000000e+00> : vector<16x128xf32>
    %23 = tpu.matmul %20, %22, %cst_31 {dimension_numbers = #tpu.dot_dimension_numbers<[1], [0], [0], [1], [0, 0, 1, 1], [], []>} : vector<16x4xbf16>, vector<4x128xbf16>, vector<16x128xf32> -> vector<16x128xf32>
    %24 = arith.addf %18, %23 : vector<16x128xf32>
    %c0_32 = arith.constant 0 : index
    %c0_33 = arith.constant 0 : index
    %c0_34 = arith.constant 0 : index
    %c1_35 = arith.constant 1 : index
    %c0_36 = arith.constant 0 : index
    %25 = vector.load %arg3[%c0_32, %c0_33, %c0_34, %c1_35, %c0_36] : memref<1x1x1x18x4xbf16, #tpu.memory_space<vmem>>, vector<1x1x1x16x4xbf16>
    %26 = vector.shape_cast %25 : vector<1x1x1x16x4xbf16> to vector<16x4xbf16>
    %c4 = arith.constant 4 : index
    %c0_37 = arith.constant 0 : index
    %c0_38 = arith.constant 0 : index
    %27 = vector.load %arg5[%c4, %c0_37, %c0_38] : memref<9x4x128xbf16, #tpu.memory_space<vmem>>, vector<1x4x128xbf16>
    %28 = vector.shape_cast %27 : vector<1x4x128xbf16> to vector<4x128xbf16>
    %cst_39 = arith.constant dense<0.000000e+00> : vector<16x128xf32>
    %29 = tpu.matmul %26, %28, %cst_39 {dimension_numbers = #tpu.dot_dimension_numbers<[1], [0], [0], [1], [0, 0, 1, 1], [], []>} : vector<16x4xbf16>, vector<4x128xbf16>, vector<16x128xf32> -> vector<16x128xf32>
    %30 = arith.addf %24, %29 : vector<16x128xf32>
    %c0_40 = arith.constant 0 : index
    %c0_41 = arith.constant 0 : index
    %c0_42 = arith.constant 0 : index
    %c2_43 = arith.constant 2 : index
    %c0_44 = arith.constant 0 : index
    %31 = vector.load %arg3[%c0_40, %c0_41, %c0_42, %c2_43, %c0_44] : memref<1x1x1x18x4xbf16, #tpu.memory_space<vmem>>, vector<1x1x1x16x4xbf16>
    %32 = vector.shape_cast %31 : vector<1x1x1x16x4xbf16> to vector<16x4xbf16>
    %c5 = arith.constant 5 : index
    %c0_45 = arith.constant 0 : index
    %c0_46 = arith.constant 0 : index
    %33 = vector.load %arg5[%c5, %c0_45, %c0_46] : memref<9x4x128xbf16, #tpu.memory_space<vmem>>, vector<1x4x128xbf16>
    %34 = vector.shape_cast %33 : vector<1x4x128xbf16> to vector<4x128xbf16>
    %cst_47 = arith.constant dense<0.000000e+00> : vector<16x128xf32>
    %35 = tpu.matmul %32, %34, %cst_47 {dimension_numbers = #tpu.dot_dimension_numbers<[1], [0], [0], [1], [0, 0, 1, 1], [], []>} : vector<16x4xbf16>, vector<4x128xbf16>, vector<16x128xf32> -> vector<16x128xf32>
    %36 = arith.addf %30, %35 : vector<16x128xf32>
    %c0_48 = arith.constant 0 : index
    %c0_49 = arith.constant 0 : index
    %c0_50 = arith.constant 0 : index
    %c0_51 = arith.constant 0 : index
    %c0_52 = arith.constant 0 : index
    %37 = vector.load %arg4[%c0_48, %c0_49, %c0_50, %c0_51, %c0_52] : memref<1x1x1x18x4xbf16, #tpu.memory_space<vmem>>, vector<1x1x1x16x4xbf16>
    %38 = vector.shape_cast %37 : vector<1x1x1x16x4xbf16> to vector<16x4xbf16>
    %c6 = arith.constant 6 : index
    %c0_53 = arith.constant 0 : index
    %c0_54 = arith.constant 0 : index
    %39 = vector.load %arg5[%c6, %c0_53, %c0_54] : memref<9x4x128xbf16, #tpu.memory_space<vmem>>, vector<1x4x128xbf16>
    %40 = vector.shape_cast %39 : vector<1x4x128xbf16> to vector<4x128xbf16>
    %cst_55 = arith.constant dense<0.000000e+00> : vector<16x128xf32>
    %41 = tpu.matmul %38, %40, %cst_55 {dimension_numbers = #tpu.dot_dimension_numbers<[1], [0], [0], [1], [0, 0, 1, 1], [], []>} : vector<16x4xbf16>, vector<4x128xbf16>, vector<16x128xf32> -> vector<16x128xf32>
    %42 = arith.addf %36, %41 : vector<16x128xf32>
    %c0_56 = arith.constant 0 : index
    %c0_57 = arith.constant 0 : index
    %c0_58 = arith.constant 0 : index
    %c1_59 = arith.constant 1 : index
    %c0_60 = arith.constant 0 : index
    %43 = vector.load %arg4[%c0_56, %c0_57, %c0_58, %c1_59, %c0_60] : memref<1x1x1x18x4xbf16, #tpu.memory_space<vmem>>, vector<1x1x1x16x4xbf16>
    %44 = vector.shape_cast %43 : vector<1x1x1x16x4xbf16> to vector<16x4xbf16>
    %c7 = arith.constant 7 : index
    %c0_61 = arith.constant 0 : index
    %c0_62 = arith.constant 0 : index
    %45 = vector.load %arg5[%c7, %c0_61, %c0_62] : memref<9x4x128xbf16, #tpu.memory_space<vmem>>, vector<1x4x128xbf16>
    %46 = vector.shape_cast %45 : vector<1x4x128xbf16> to vector<4x128xbf16>
    %cst_63 = arith.constant dense<0.000000e+00> : vector<16x128xf32>
    %47 = tpu.matmul %44, %46, %cst_63 {dimension_numbers = #tpu.dot_dimension_numbers<[1], [0], [0], [1], [0, 0, 1, 1], [], []>} : vector<16x4xbf16>, vector<4x128xbf16>, vector<16x128xf32> -> vector<16x128xf32>
    %48 = arith.addf %42, %47 : vector<16x128xf32>
    %c0_64 = arith.constant 0 : index
    %c0_65 = arith.constant 0 : index
    %c0_66 = arith.constant 0 : index
    %c2_67 = arith.constant 2 : index
    %c0_68 = arith.constant 0 : index
    %49 = vector.load %arg4[%c0_64, %c0_65, %c0_66, %c2_67, %c0_68] : memref<1x1x1x18x4xbf16, #tpu.memory_space<vmem>>, vector<1x1x1x16x4xbf16>
    %50 = vector.shape_cast %49 : vector<1x1x1x16x4xbf16> to vector<16x4xbf16>
    %c8 = arith.constant 8 : index
    %c0_69 = arith.constant 0 : index
    %c0_70 = arith.constant 0 : index
    %51 = vector.load %arg5[%c8, %c0_69, %c0_70] : memref<9x4x128xbf16, #tpu.memory_space<vmem>>, vector<1x4x128xbf16>
    %52 = vector.shape_cast %51 : vector<1x4x128xbf16> to vector<4x128xbf16>
    %cst_71 = arith.constant dense<0.000000e+00> : vector<16x128xf32>
    %53 = tpu.matmul %50, %52, %cst_71 {dimension_numbers = #tpu.dot_dimension_numbers<[1], [0], [0], [1], [0, 0, 1, 1], [], []>} : vector<16x4xbf16>, vector<4x128xbf16>, vector<16x128xf32> -> vector<16x128xf32>
    %54 = arith.addf %48, %53 : vector<16x128xf32>
    %c0_72 = arith.constant 0 : index
    %c0_73 = arith.constant 0 : index
    %55 = vector.load %arg6[%c0_72, %c0_73] : memref<1x128xf32, #tpu.memory_space<vmem>>, vector<1x128xf32>
    %56 = vector.broadcast %55 : vector<1x128xf32> to vector<16x128xf32>
    %57 = arith.addf %54, %56 : vector<16x128xf32>
    %cst_74 = arith.constant 0.000000e+00 : f32
    %58 = vector.broadcast %cst_74 : f32 to vector<16x128xf32>
    %59 = arith.maximumf %57, %58 : vector<16x128xf32>
    %c0_75 = arith.constant 0 : index
    %c0_76 = arith.constant 0 : index
    %c0_77 = arith.constant 0 : index
    %c0_78 = arith.constant 0 : index
    %60 = vector.load %arg7[%c0_75, %c0_76, %c0_77, %c0_78] : memref<1x1x16x128xf32, #tpu.memory_space<vmem>>, vector<1x1x16x128xf32>
    %61 = vector.shape_cast %60 : vector<1x1x16x128xf32> to vector<16x128xf32>
    %62 = vector.shape_cast %59 : vector<16x128xf32> to vector<1x1x16x128xf32>
    tpu.vector_store %arg7[%c0_75, %c0_76, %c0_77, %c0_78], %62 {strides = array<i32>} : memref<1x1x16x128xf32, #tpu.memory_space<vmem>>, vector<1x1x16x128xf32>,
    return
  }
  func.func @transform_0(%arg0: i32, %arg1: i32) -> (i32, i32, i32, i32, i32) {
    %c1_i32 = arith.constant 1 : i32
    %0 = arith.muli %arg1, %c1_i32 : i32
    %c0_i32 = arith.constant 0 : i32
    %1 = arith.addi %0, %c0_i32 : i32
    %c0_i32_0 = arith.constant 0 : i32
    %c0_i32_1 = arith.constant 0 : i32
    %c0_i32_2 = arith.constant 0 : i32
    %c0_i32_3 = arith.constant 0 : i32
    return %arg0, %1, %c0_i32_0, %c0_i32_1, %c0_i32_2 : i32, i32, i32, i32, i32
  }
  func.func @transform_1(%arg0: i32, %arg1: i32) -> (i32, i32, i32, i32, i32) {
    %c1_i32 = arith.constant 1 : i32
    %0 = arith.muli %arg1, %c1_i32 : i32
    %c1_i32_0 = arith.constant 1 : i32
    %1 = arith.addi %0, %c1_i32_0 : i32
    %c0_i32 = arith.constant 0 : i32
    %c0_i32_1 = arith.constant 0 : i32
    %c0_i32_2 = arith.constant 0 : i32
    %c0_i32_3 = arith.constant 0 : i32
    return %arg0, %1, %c0_i32, %c0_i32_1, %c0_i32_2 : i32, i32, i32, i32, i32
  }
  func.func @transform_2(%arg0: i32, %arg1: i32) -> (i32, i32, i32, i32, i32) {
    %c1_i32 = arith.constant 1 : i32
    %0 = arith.muli %arg1, %c1_i32 : i32
    %c2_i32 = arith.constant 2 : i32
    %1 = arith.addi %0, %c2_i32 : i32
    %c0_i32 = arith.constant 0 : i32
    %c0_i32_0 = arith.constant 0 : i32
    %c0_i32_1 = arith.constant 0 : i32
    %c0_i32_2 = arith.constant 0 : i32
    return %arg0, %1, %c0_i32, %c0_i32_0, %c0_i32_1 : i32, i32, i32, i32, i32
  }
  func.func @transform_3(%arg0: i32, %arg1: i32) -> (i32, i32, i32) {
    %c0_i32 = arith.constant 0 : i32
    %c0_i32_0 = arith.constant 0 : i32
    %c0_i32_1 = arith.constant 0 : i32
    %c0_i32_2 = arith.constant 0 : i32
    return %c0_i32, %c0_i32_0, %c0_i32_1 : i32, i32, i32
  }
  func.func @transform_4(%arg0: i32, %arg1: i32) -> (i32, i32) {
    %c0_i32 = arith.constant 0 : i32
    %c0_i32_0 = arith.constant 0 : i32
    %c0_i32_1 = arith.constant 0 : i32
    return %c0_i32, %c0_i32_0 : i32, i32
  }
  func.func @transform_5(%arg0: i32, %arg1: i32) -> (i32, i32, i32, i32) {
    %c0_i32 = arith.constant 0 : i32
    %c0_i32_0 = arith.constant 0 : i32
    %c0_i32_1 = arith.constant 0 : i32
    return %arg0, %arg1, %c0_i32, %c0_i32_0 : i32, i32, i32, i32
  }
}

</mosaic_0001>

<bundles_post_ra>
// kernel: tpu_custom_call.1
= control target key start
LH: loop header
LB: loop body
LE: loop exit
PB: predicated region body
PF: predicated region fallthrough
CT: control target
= control target key end

     0   :  { %10 = vsyncpa [#allocation3], 0  ;;  %s1285_s0 = inlined_call_operand.vmem [shape: bf16[2,18,1,18,4], index: 0, kind: input, shape index: {}]   ;;  %s1286_s1 = inlined_call_operand.vmem [shape: bf16[2,18,1,18,4], index: 1, kind: input, shape index: {}]   ;;  %s1287_s2 = inlined_call_operand.vmem [shape: bf16[2,18,1,18,4], index: 2, kind: input, shape index: {}]   ;;  %s1288_s3 = inlined_call_operand.vmem [shape: bf16[9,4,128], index: 3, kind: input, shape index: {}]   ;;  %s1289_s4 = inlined_call_operand.vmem [shape: f32[1,128], index: 4, kind: input, shape index: {}]   ;;  %s1290_s5 = inlined_call_operand.hbm [shape: f32[2,16,16,128], index: 5, kind: output, shape index: {}]  }
   0x1   :  { %12 = vsyncpa [#allocation3 + $0x1], 0  ;;  %s1076_s18 = smov 0   ;;  %s1078_s19 = smov 0  }
   0x2   :  { %s1080_s20 = smov 0   ;;  %s1082_s21 = smov 0  }
   0x3   :  { %s1084_s22 = smov 0   ;;  %s1086_s23 = smov 0  }
   0x4   :  { %s1088_s24 = smov 0   ;;  %s1090_s25 = smov 0  }
   0x5 LB: > { %1294 = sst [smem:[#allocation5_spill]] %s1038_s24  ;;  %s807_s26 = sadd.s32 4294967295, %s1042_s25   ;;  %s1042_s25 = sphi %s1090_s25, %s18_s25   ;;  %s1038_s24 = sphi %s1088_s24, %s1302_s24   ;;  %s1034_s23 = sphi %s1086_s23, %s1307_s23   ;;  %s1030_s22 = sphi %s1084_s22, %s1300_s22   ;;  %s1026_s21 = sphi %s1082_s21, %s1306_s21   ;;  %s1022_s20 = sphi %s1080_s20, %s1305_s20   ;;  %s1018_s19 = sphi %s1078_s19, %s1304_s19   ;;  %s1014_s18 = sphi %s1076_s18, %s1303_s18  }
   0x6   : > { %s808_s27 = sadd.s32 4294967294, %s1042_s25   ;;  %s27_s28 = sadd.s32 1, %s1034_s23 }
   0x7   : > { %p28_p0 = scmp.ge.s32.totalorder %s27_s28, 16  ;;  %s30_s29 = sadd.s32 1, %s1038_s24 }
   0x8   : > { %p179_p1 = scmp.ne.s32.totalorder %s1022_s20, %s1018_s19  ;;  %p180_p2 = scmp.eq.s32.totalorder %s807_s26, 31 }
   0x9   : > { %s1309_s28 = smov (%p28_p0, %s27_s28), 0  ;;  %s1311_s29 = smov (!%p28_p0, %s30_s29), %s1038_s24 }
   0xa   : > { %1295 = sst [smem:[#allocation6_spill]] %s1309_s28  ;;  %s165_s30 = ssub.s32 %s1034_s23, %s1309_s28 }
   0xb   : > { %p1127_p3 = por %p180_p2, %p179_p1  ;;  %p32_p4 = scmp.ge.s32.totalorder %s1311_s29, 2 }
   0xc   : > { %p185_p5 = scmp.ne.s32.totalorder %s1018_s19, %s1014_s18  ;;  %p186_p6 = scmp.eq.s32.totalorder %s808_s27, 31 }
   0xd   : > { %p811_p7 = scmp.ge.s32.totalorder %s1042_s25, 1  ;;  %s1313_s29 = smov (%p32_p4, %s1311_s29), 0 }
   0xe   : > { %1297 = sst [smem:[#allocation7_spill]] %s1313_s29  ;;  %p1136_p8 = por %p186_p6, %p185_p5 }
   0xf   : > { %p250_p9 = scmp.lt.s32.totalorder %s1042_s25, 33  ;;  %s164_s8 = ssub.s32 %s1038_s24, %s1313_s29 }
  0x10   : > { %s169_s9 = sadd.s32 1, %s1022_s20  ;;  %s166_s10 = sor.u32 %s165_s30, %s164_s8 }
  0x11   : > { %p251_p10 = pnand %p811_p7, %p250_p9  ;;  %p167_p11 = scmp.eq.s32.totalorder %s166_s10, 0 }
  0x12   : > { %p302_p12 = scmp.lt.s32.totalorder (!%p251_p10), %s1030_s22, 1  ;;  %p304_p13 = scmp.lt.s32.totalorder (!%p251_p10), %s1026_s21, 17 }
  0x13   : > { %s1145_s11 = scalar_select %p167_p11, %s1022_s20, %s169_s9  }
  0x14   : > { %254 = sbr.rel (%p251_p10) target bundleno = 221 (0xdd), region = 40  ;;  %s311_s8 = sadd.s32 (!%p251_p10), 1, %s1026_s21 }
  0x15   : > { %p314_p0 = scmp.lt.s32.totalorder (!%p251_p10), %s311_s8, 17  ;;  %s322_s9 = sadd.s32 (!%p251_p10), 2, %s1026_s21 }
  0x16   : > { %p1188_p1 = scmp.lt.s32.totalorder (!%p251_p10), %s322_s9, 17  ;;  %s968_s26 = scalar_lea.hbm (!%p251_p10), %s1290_s5, 512 }
  0x19   : > { %vm365_vm0 = vcmask 1041408   ;;  %v819_v0 = vld [vmem:[%s1288_s3 + $0x4] sm:$0x3]  ;;  %v816_v1 = vld [vmem:[%s1288_s3 + $0x2] sm:$0x3]  ;;  %s303_s30 = scalar_select %p302_p12, %s1030_s22, 1 }
  0x1a   : > { %v416_v2 = vsel %vm365_vm0, %v819_v0, 0  ;;  %v367_v3 = vsel %vm365_vm0, %v816_v1, 0  ;;  %v336_v4 = vld [vmem:[%s1288_s3] sm:$0x3]  ;;  %v821_v5 = vld [vmem:[%s1288_s3 + $0x6] sm:$0x3] }
  0x1b   : > { %425 = vmatpush.bf16.msra.mxu2 %v416_v2  ;;  %376 = vmatpush.bf16.msra.mxu0 %v367_v3  ;;  %v386_v6 = vsel %vm365_vm0, %v336_v4, 0  ;;  %v447_v7 = vsel %vm365_vm0, %v821_v5, 0  ;;  %v827_v8 = vld [vmem:[%s1288_s3 + $0x8] sm:$0x3]  ;;  %s1170_s12 = smul.u32 54, %s303_s30  ;;  %s1315_s8 = smov (!%p314_p0, %s311_s8), 17 }
  0x1c   : > { %395 = vmatpush.bf16.msra.mxu1 %v386_v6  ;;  %456 = vmatpush.bf16.msra.mxu3 %v447_v7  ;;  %v494_v9 = vsel %vm365_vm0, %v827_v8, 0  ;;  %v831_v10 = vld [vmem:[%s1288_s3 + $0xc] sm:$0x3]  ;;  %s305_s15 = scalar_select %p304_p13, %s1026_s21, 17  ;;  %v837_v12 = vld [vmem:[%s1288_s3 + $0xe] sm:$0x3] }
  0x1d   : > { %v556_v11 = vsel %vm365_vm0, %v831_v10, 0  ;;  %v829_v13 = vld [vmem:[%s1288_s3 + $0xa] sm:$0x3]  ;;  %v603_v14 = vsel %vm365_vm0, %v837_v12, 0  ;;  %s872_s10 = smul.u32 3, %s1315_s8  ;;  %vm361_vm1 = vcmask 31744  }
  0x1e   : > { %v525_v15 = vsel %vm365_vm0, %v829_v13, 0  ;;  %s870_s30 = smul.u32 3, %s305_s15  ;;  %s1317_s9 = smov (!%p1188_p1, %s322_s9), 17  ;;  %vm408_vm2 = vcmask 1046528   ;;  %v839_v34 = vld [vmem:[%s1288_s3 + $0x10] sm:$0x3] }
  0x1f   : > { %503 = vmatpush.bf16.msrb.mxu0 %v494_v9  ;;  %565 = vmatpush.bf16.msrb.mxu2 %v556_v11  ;;  %s318_s17 = sadd.s32 %s872_s10, %s1170_s12  ;;  %s873_s24 = smul.u32 3, %s1317_s9  ;;  %vm348_vm3 = vsmask.f32 7424  ;;  %v634_v42 = vsel %vm365_vm0, %v839_v34, 0 }
  0x20   : > { %612 = vmatpush.bf16.msrb.mxu3 %v603_v14  ;;  %534 = vmatpush.bf16.msrb.mxu1 %v525_v15  ;;  %s308_s13 = sadd.s32 %s1170_s12, %s870_s30  ;;  %s814_s28 = sshll.u32 %s318_s17, 2 }
  0x21   : > { %s813_s16 = sshll.u32 %s308_s13, 2  ;;  %s1199_s8 = scalar_lea.vmem %s1286_s1, %s814_s28 }
  0x22   : > { %s310_s29 = scalar_lea.vmem %s1285_s0, %s813_s16  ;;  %v847_v22 = vld [vmem:[%s1199_s8] sm:$0xff]  ;;  %v467_v25 = vld [vmem:[%s1199_s8 + $0x8] sm:$0x1]  ;;  %s329_s28 = sadd.s32 %s873_s24, %s1170_s12 }
  0x23   : > { %v861_v16 = vld [vmem:[%s310_s29] sm:$0xf0]  ;;  %v337_v17 = vld [vmem:[%s310_s29 + $0x8] sm:$0x1]  ;;  %v862_v18 = vld [vmem:[%s310_s29] sm:$0xe]  ;;  %826 = vmatmul.msk.bf16.vlgmr.msra.gmra.mxu3 %vm361_vm1, %v847_v22  ;;  %v475_v33 = vunpack.c.l.b16 %v467_v25 }
  0x24   : > { %v345_v19 = vunpack.c.l.b16 %v337_v17  ;;  %v863_v20 = vor.u32 %v862_v18, %v861_v16  ;;  %v850_v21 = vld [vmem:[%s310_s29] sm:$0xff]   ;;  %s815_s10 = sshll.u32 %s329_s28, 2  ;;  %s842_s12 = sshll.u32 %s1026_s21, 1 }
  0x25   : > { %v350_v23 = vshrl.u32 %v850_v21, 16  ;;  %v352_v24 = vshll.u32 %v850_v21, 16  ;;  %818 = vmatmul.msk.bf16.vlgmr.msra.gmra.mxu1 %vm361_vm1, %v850_v21  ;;  %v864_v29 = vld [vmem:[%s1199_s8] sm:$0xf0]  ;;  %v865_v30 = vld [vmem:[%s1199_s8] sm:$0xe]  ;;  %s1217_s14 = scalar_lea.vmem %s1287_s2, %s815_s10  ;;  %v477_v44 = vpack.c.b16 %v475_v33, %v475_v33 }
  0x26   : > { %v347_v26 = vpack.c.b16 %v345_v19, %v345_v19  ;;  %v409_v27 = vrot.slane %v863_v20, 1  ;;  %v866_v38 = vor.u32 %v865_v30, %v864_v29  ;;  %v854_v39 = vld [vmem:[%s1199_s8] sm:$0xff]   ;;  %v576_v41 = vld [vmem:[%s1217_s14 + $0x8] sm:$0x1]  ;;  %s843_s16 = sshll.u32 %s1030_s22, 5  ;;  %s299_s17 = sand.u32 1, %s1018_s19  }
  0x27   : > { %v354_v28 = vrot.slane %v352_v24, 1  ;;  %v858_v40 = vld [vmem:[%s1217_s14] sm:$0xff]   ;;  %v584_v45 = vunpack.c.l.b16 %v576_v41  ;;  %v481_v48 = vshll.u32 %v854_v39, 16  ;;  %v519_v51 = vrot.slane %v477_v44, 1  ;;  %s674_s15 = sadd.s32 %s843_s16, %s842_s12  ;;  %s812_s8 = sshll.u32 %s299_s17, 4 }
  0x28   : > { %v410_v31 = vrot.slane %v347_v26, 1  ;;  %v357_v32 = vshll.u32 %v347_v26, 16  ;;  %v588_v46 = vshrl.u32 %v858_v40, 16  ;;  %v590_v47 = vshll.u32 %v858_v40, 16  ;;  %v848_v63 = vld [vmem:[%s1217_s14] sm:$0xff]  ;;  %s844_s24 = sshll.u32 %s674_s15, 3 }
  0x29   : > { %v355_v35 = vor.u32 %v354_v28, %v350_v23  ;;  %v586_v49 = vpack.c.b16 %v584_v45, %v584_v45  ;;  %v518_v50 = vrot.slane %v866_v38, 1  ;;  %v479_v54 = vshrl.u32 %v854_v39, 16  ;;  %v867_v1 = vld [vmem:[%s1217_s14] sm:$0xf0]  ;;  %v868_v2 = vld [vmem:[%s1217_s14] sm:$0xe]  ;;  %s676_s22 = scalar_lea.hbm %s1290_s5, %s844_s24 }
  0x2a   : > { %v411_v36 = vsel %vm408_vm2, %v409_v27, %v410_v31  ;;  %v359_v37 = vrot.slane %v357_v32, 1  ;;  %v592_v52 = vrot.slane %v590_v47, 1  ;;  %v483_v56 = vrot.slane %v481_v48, 1  ;;  %v947_v33 = vld [vmem:[%s1289_s4] ss:$0 sm:$0xff]  ;;  %s301_s29 = scalar_lea.vmem [#allocation2], %s812_s8 }
  0x2b   : > { %820 = vmatmul.msk.bf16.vlgmr.msra.gmra.mxu2 %vm361_vm1, %v411_v36  ;;  %v595_v53 = vshll.u32 %v586_v49, 16  ;;  %v486_v57 = vshll.u32 %v477_v44, 16  ;;  %v520_v59 = vsel %vm408_vm2, %v518_v50, %v519_v51  ;;  %v869_v3 = vor.u32 %v868_v2, %v867_v1  ;;  %s677_s30 = sshll.u32 %s301_s29, 4  ;;  %s679_s10 = sshll.u32 %s676_s22, 4  ;;  %s678_s30 = int_to_ptr.vmem [resolvable:$true] %s677_s30  ;;  %s680_s10 = int_to_ptr.hbm [resolvable:$true] %s679_s10 }
  0x2c   : > { %v360_v43 = vsel %vm348_vm3, %v355_v35, %v359_v37  ;;  %v593_v55 = vor.u32 %v592_v52, %v588_v46  ;;  %v484_v61 = vor.u32 %v483_v56, %v479_v54  ;;  %v628_v5 = vrot.slane %v586_v49, 1  ;;  %s663_s9 = scalar_lea.sflag [#allocation3], %s299_s17  ;;  %s962_s13 = sshra.s32 %s680_s10, 4  ;;  %s963_s13 = int_to_ptr.hbm [resolvable:$true] %s962_s13 }
  0x2d   : > { %817 = vmatmul.msk.bf16.vlgmr.msra.gmra.mxu0 %vm361_vm1, %v360_v43  ;;  %v597_v58 = vrot.slane %v595_v53, 1  ;;  %v488_v62 = vrot.slane %v486_v57, 1  ;;  %v627_v4 = vrot.slane %v869_v3, 1  ;;  %s964_s14 = scalar_lea.hbm %s963_s13, 16  ;;  %p969_p6 = scmp.lt.s32.totalorder %s963_s13, %s1290_s5 }
  0x2e   : > { %643 = vmatpush.bf16.msra.mxu0 %v634_v42  ;;  %p965_p2 = scmp.ne.s32.totalorder %s963_s13, %s964_s14  ;;  %p970_p7 = scmp.lt.s32.totalorder %s968_s26, %s964_s14 }
  0x2f   : > { %v598_v60 = vsel %vm348_vm3, %v593_v55, %v597_v58  ;;  %v489_v0 = vsel %vm348_vm3, %v484_v61, %v488_v62  ;;  %v629_v6 = vsel %vm408_vm2, %v627_v4, %v628_v5 }
  0x30   : > { %p966_p4 = pnand %p965_p2, %p1127_p3  ;;  %p971_p9 = por %p970_p7, %p969_p6 }
  0x32   : > { %p967_p5 = pneg %p966_p4 }
  0x33   : > { %838 = vmatmul.msk.bf16.vlgmr.msrb.gmra.mxu3 %vm361_vm1, %v598_v60 }
  0x34   : > { %p972_p10 = pnand %p971_p9, %p967_p5 }
  0x35   : > { %830 = vmatmul.msk.bf16.vlgmr.msrb.gmra.mxu1 %vm361_vm1, %v520_v59 }
  0x3b   : > { %836 = vmatmul.msk.bf16.vlgmr.msrb.gmra.mxu2 %vm361_vm1, %v848_v63 }
  0x3d   : > { %828 = vmatmul.msk.bf16.vlgmr.msrb.gmra.mxu0 %vm361_vm1, %v489_v0 }
  0x4d   : > { %840 = vmatmul.msk.bf16.vlgmr.msra.gmra.mxu0 %vm361_vm1, %v629_v6 }
  0xa2   : > { %v397_v8 = vpop.f32.mrf.mxu1 }
  0xa6   : > { %v458_v10 = vpop.f32.mrf.mxu3 }
  0xaa   : > { %v378_v7 = vpop.f32.mrf.mxu0  ;;  %v399_v12 = vpop.f32.mrf.mxu1 }
  0xab   : > { %v398_v13 = vadd.f32 %v397_v8, %v378_v7 }
  0xae   : > { %v427_v9 = vpop.f32.mrf.mxu2  ;;  %v460_v16 = vpop.f32.mrf.mxu3 }
  0xaf   : > { %v432_v15 = vadd.f32 %v427_v9, %v398_v13 }
  0xb1   : > { %v463_v18 = vadd.f32 %v458_v10, %v432_v15 }
  0xb2   : > { %v380_v11 = vpop.f32.mrf.mxu0  ;;  %v536_v19 = vpop.f32.mrf.mxu1 }
  0xb3   : > { %v400_v20 = vadd.f32 %v399_v12, %v380_v11 }
  0xb6   : > { %v429_v14 = vpop.f32.mrf.mxu2  ;;  %v614_v27 = vpop.f32.mrf.mxu3 }
  0xb7   : > { %v433_v22 = vadd.f32 %v429_v14, %v400_v20 }
  0xb9   : > { %v464_v26 = vadd.f32 %v460_v16, %v433_v22 }
  0xba   : > { %v505_v17 = vpop.f32.mrf.mxu0  ;;  %v538_v30 = vpop.f32.mrf.mxu1 }
  0xbb   : > { %v510_v21 = vadd.f32 %v505_v17, %v463_v18 }
  0xbd   : > { %v541_v24 = vadd.f32 %v536_v19, %v510_v21 }
  0xbe   : > { %v567_v23 = vpop.f32.mrf.mxu2  ;;  %v616_v39 = vpop.f32.mrf.mxu3 }
  0xbf   : > { %v572_v28 = vadd.f32 %v567_v23, %v541_v24 }
  0xc1   : > { %v619_v31 = vadd.f32 %v614_v27, %v572_v28 }
  0xc2   : > { %v507_v25 = vpop.f32.mrf.mxu0 }
  0xc3   : > { %v511_v29 = vadd.f32 %v507_v25, %v464_v26 }
  0xc5   : > { %v542_v32 = vadd.f32 %v538_v30, %v511_v29 }
  0xc6   : > { %v569_v34 = vpop.f32.mrf.mxu2 }
  0xc7   : > { %v573_v37 = vadd.f32 %v569_v34, %v542_v32 }
  0xc9   : > { %v620_v41 = vadd.f32 %v616_v39, %v573_v37 }
  0xca   : > { %v645_v35 = vpop.f32.mrf.mxu0 }
  0xcb   : > { %v650_v36 = vadd.f32 %v645_v35, %v619_v31 }
  0xcd   : > { %v656_v38 = vadd.f32 %v947_v33, %v650_v36 }
  0xcf   : > { %v658_v40 = vmax.f32 %v656_v38, 0.0 }
  0xd1   : > { %660 = vst [vmem:[%s301_s29] sm:$0xff] %v658_v40 }
  0xd2   : > { %v647_v42 = vpop.f32.mrf.mxu0 }
  0xd3   : > { %v651_v43 = vadd.f32 %v647_v42, %v620_v41 }
  0xd5   : > { %v657_v44 = vadd.f32 %v947_v33, %v651_v43 }
  0xd7   : > { %v659_v45 = vmax.f32 %v657_v44, 0.0 }
  0xd9   : > { %661 = vst [vmem:[%s301_s29 + $0x8] sm:$0xff] %v659_v45 }
  0xda   : > { %975 = shalt.err (!%p972_p10)
}
  0xdb   : > { %s1044_s17 = smov 128   ;;  %s1045_s8 = smov 8  }
  0xdc   : > { %874 = dma.vmem_to_hbm [thread:$0]  (%p1127_p3), %s678_s30, 256, %s680_s10, %s663_s9, %s1044_s17, %s1044_s17, %s1045_s8  }
  0xdd PF: > { %p880_p11 = scmp.ge.s32.totalorder %s1042_s25, 2  ;;  %s694_s24 = sand.u32 1, %s1014_s18  }
  0xde   : > { %s695_s28 = scalar_lea.sflag [#allocation3], %s694_s24 }
  0xdf   : > { %p877_p12 = pnand %p880_p11, %p1136_p8 }
  0xe1   : > { %p878_p13 = pneg %p877_p12 }
  0xe3   : > { %1009 = dma.done.wait (%p878_p13), %s695_s28, 256  }
  0xe4   : > { %1011 = vsyncadd (%p878_p13), %s695_s28, 4294967040  ;;  %s18_s25 = sadd.s32 1, %s1042_s25   ;;  %s1300_s22 = sld [smem:[#allocation5_spill]] }
  0xe5   : > { %p15_p0 = scmp.ge.s32.totalorder %s18_s25, 34   ;;  %s1301_s6 = sld [smem:[#allocation6_spill]] }
  0xe6   : > { %s1302_s24 = sld [smem:[#allocation7_spill]]  ;;  %s1303_s18 = smov %s1018_s19 }
  0xe7   : > { %s1304_s19 = smov %s1022_s20  ;;  %s1305_s20 = smov %s1145_s11 }
  0xe8   : > { %s1306_s21 = smov %s1034_s23  ;;  %17 = sbr.rel (!%p15_p0) target bundleno = 5 (0x5), region = 89 }
  0xeb   : > { %s1307_s23 = smov %s1301_s6 }
  0xed   :  { %701 = vsyncpa [#allocation3], 1 }
  0xee   :  { %703 = vsyncpa [#allocation3 + $0x1], 1 }

</bundles_post_ra>
